<compile_context>
chip_gen: v6e
topology: v6e:2x2x1
jax: 0.10.0
libtpu: 0.0.40
codegen_flags: <defaults>
</compile_context>

<pallas_src>
import math

import jax
import jax.numpy as jnp
from jax.experimental import pallas as pl
from jax.experimental.pallas import tpu as pltpu

_LANE = 128
_SUBLANE = 8
_MAX_TILE = 4096  # rows per grid step; big enough that ~0.35us step overhead is noise


def _round_up(n, m):
    return ((n + m - 1) // m) * m


def _mlp_kernel(x_ref, w1_ref, b1_ref, w2_ref, b2_ref, w3_ref, b3_ref, o_ref):
    # Fused 3-layer MLP on one batch tile; bias+ReLU are VPU filler under the MXU.
    x = x_ref[...]

    h = jnp.dot(x, w1_ref[...], preferred_element_type=jnp.float32) + b1_ref[...]
    h = jnp.maximum(h, 0.0)                                   # F.relu
    h = h.astype(w2_ref.dtype)

    h = jnp.dot(h, w2_ref[...], preferred_element_type=jnp.float32) + b2_ref[...]
    h = jnp.maximum(h, 0.0)                                   # F.relu
    h = h.astype(w3_ref.dtype)

    out = jnp.dot(h, w3_ref[...], preferred_element_type=jnp.float32) + b3_ref[...]
    o_ref[...] = out.astype(o_ref.dtype)


def _choose_block_b(B):
    """Near-equal batch chunks of at most _MAX_TILE rows (single tile if it fits)."""
    n_chunks = max(1, pl.cdiv(B, _MAX_TILE))
    return max(_SUBLANE, _round_up(pl.cdiv(B, n_chunks), _SUBLANE))


def init_linear_nn_params(key, in_dim, out_dim, hidden_dims=(64, 64)):
    """Xavier-normal weights (zero biases), matching nn.init.xavier_normal_ /
    nn.init.constant_(bias, 0).  Stored in [in, out] layout (transposed vs torch)."""
    dims = [in_dim, *hidden_dims, out_dim]
    params = {}
    for li in range(len(dims) - 1):
        fan_in, fan_out = dims[li], dims[li + 1]
        key, sub = jax.random.split(key)
        std = math.sqrt(2.0 / (fan_in + fan_out))
        params[f"w{li + 1}"] = std * jax.random.normal(
            sub, (fan_in, fan_out), dtype=jnp.float32)
        params[f"b{li + 1}"] = jnp.zeros((fan_out,), dtype=jnp.float32)
    return params


def prepare_linear_nn_params(params, compute_dtype=jnp.float32):
    """Pad hidden feature dims to 128 lanes ONCE (call at init, not per forward).

    Zero pad columns + zero biases + ReLU(0)=0 keep the math exactly equivalent.
    The final output dim is intentionally left unpadded (narrow lane-masked stores
    are cheaper than 16x HBM writeback + a slice pass)."""
    w1, w2, w3 = params["w1"], params["w2"], params["w3"]
    b1, b2, b3 = params["b1"], params["b2"], params["b3"]
    in_dim, h0 = w1.shape
    h1 = w2.shape[1]
    out_dim = w3.shape[1]
    h0_p = _round_up(h0, _LANE)
    h1_p = _round_up(h1, _LANE)

    wd = compute_dtype
    prepared = {
        "w1": jnp.pad(w1, ((0, 0), (0, h0_p - h0))).astype(wd),
        "b1": jnp.pad(b1, (0, h0_p - h0)).reshape(1, h0_p).astype(jnp.float32),
        "w2": jnp.pad(w2, ((0, h0_p - h0), (0, h1_p - h1))).astype(wd),
        "b2": jnp.pad(b2, (0, h1_p - h1)).reshape(1, h1_p).astype(jnp.float32),
        "w3": jnp.pad(w3, ((0, h1_p - h1), (0, 0))).astype(wd),
        "b3": b3.reshape(1, out_dim).astype(jnp.float32),
    }
    return prepared


def linear_nn_forward(x, prepared, *, block_b=None):
    """Fused LinearNN forward.

    x:        [B, in_dim] float32
    prepared: output of prepare_linear_nn_params (hidden dims pre-padded to 128).
    """
    B, in_dim = x.shape
    w1, w2, w3 = prepared["w1"], prepared["w2"], prepared["w3"]
    b1, b2, b3 = prepared["b1"], prepared["b2"], prepared["b3"]
    h0_p = w1.shape[1]
    h1_p = w2.shape[1]
    out_dim = w3.shape[1]

    # Optional low-precision MXU path (numerics change vs f32 reference).
    if w1.dtype != x.dtype:
        x = x.astype(w1.dtype)

    if block_b is None:
        block_b = _choose_block_b(B)
    block_b = max(_SUBLANE, _round_up(min(block_b, _round_up(B, _SUBLANE)), _SUBLANE))
    grid = (pl.cdiv(B, block_b),)

    # Batch is tiled; weights/biases use constant index_maps -> VMEM-resident.
    in_specs = [
        pl.BlockSpec((block_b, in_dim), lambda i: (i, 0)),   # x tile
        pl.BlockSpec((in_dim, h0_p), lambda i: (0, 0)),      # w1
        pl.BlockSpec((1, h0_p), lambda i: (0, 0)),           # b1
        pl.BlockSpec((h0_p, h1_p), lambda i: (0, 0)),        # w2
        pl.BlockSpec((1, h1_p), lambda i: (0, 0)),           # b2
        pl.BlockSpec((h1_p, out_dim), lambda i: (0, 0)),     # w3 (output dim unpadded)
        pl.BlockSpec((1, out_dim), lambda i: (0, 0)),        # b3
    ]
    out_spec = pl.BlockSpec((block_b, out_dim), lambda i: (i, 0))

    itemsize = jnp.dtype(w1.dtype).itemsize
    flops = 2 * B * (in_dim * h0_p + h0_p * h1_p + h1_p * out_dim)
    bytes_accessed = (
        itemsize * (B * in_dim + in_dim * h0_p + h0_p * h1_p + h1_p * out_dim)
        + 4 * (B * out_dim + h0_p + h1_p + out_dim)
    )

    return pl.pallas_call(
        _mlp_kernel,
        out_shape=jax.ShapeDtypeStruct((B, out_dim), jnp.float32),
        grid=grid,
        in_specs=in_specs,
        out_specs=out_spec,
        compiler_params=pltpu.CompilerParams(
            dimension_semantics=("parallel",)
        ),
        cost_estimate=pl.CostEstimate(
            flops=flops, transcendentals=0, bytes_accessed=bytes_accessed
        ),
    )(x, w1, b1, w2, b2, w3, b3)


def _reference_forward(x, params):
    h = jnp.maximum(x @ params["w1"] + params["b1"], 0.0)
    h = jnp.maximum(h @ params["w2"] + params["b2"], 0.0)
    return h @ params["w3"] + params["b3"]


if __name__ == "__main__":
    key = jax.random.PRNGKey(0)
    k_x, k_p, k_x2 = jax.random.split(key, 3)

    in_dim, out_dim = 16, 8
    hidden_dims = (64, 64)
    params = init_linear_nn_params(k_p, in_dim, out_dim, hidden_dims)
    prepared = prepare_linear_nn_params(params)   # pad once, reuse every forward

    # Small case (matches module-scale example shapes).
    B = 8
    x = jax.random.normal(k_x, (B, in_dim), dtype=jnp.float32)
    out = jax.block_until_ready(linear_nn_forward(x, prepared))
    ref = _reference_forward(x, params)
    assert out.shape == (B, out_dim)
    assert jnp.allclose(out, ref, atol=1e-5, rtol=1e-5)

    # Larger, ragged batch: single large balanced tile (no forced grid split).
    B2 = 520
    x2 = jax.random.normal(k_x2, (B2, in_dim), dtype=jnp.float32)
    out2 = jax.block_until_ready(linear_nn_forward(x2, prepared))
    ref2 = _reference_forward(x2, params)
    assert out2.shape == (B2, out_dim)
    assert jnp.allclose(out2, ref2, atol=1e-4, rtol=1e-4)

    # Multi-chunk path: near-equal tiles of <= 4096 rows.
    B3 = 9000
    k_x3 = jax.random.fold_in(key, 3)
    x3 = jax.random.normal(k_x3, (B3, in_dim), dtype=jnp.float32)
    out3 = jax.block_until_ready(linear_nn_forward(x3, prepared))
    ref3 = _reference_forward(x3, params)
    assert out3.shape == (B3, out_dim)
    assert jnp.allclose(out3, ref3, atol=1e-4, rtol=1e-4)

    print("KERNEL_OK")
</pallas_src>

<mosaic_0001>
module attributes {stable_mosaic.version = 11 : i64} {
  func.func @_mlp_kernel(%arg0: i32, %arg1: memref<8x16xf32, #tpu.memory_space<vmem>>, %arg2: memref<16x128xf32, #tpu.memory_space<vmem>>, %arg3: memref<1x128xf32, #tpu.memory_space<vmem>>, %arg4: memref<128x128xf32, #tpu.memory_space<vmem>>, %arg5: memref<1x128xf32, #tpu.memory_space<vmem>>, %arg6: memref<128x8xf32, #tpu.memory_space<vmem>>, %arg7: memref<1x8xf32, #tpu.memory_space<vmem>>, %arg8: memref<8x8xf32, #tpu.memory_space<vmem>>) attributes {dimension_semantics = [#tpu.dimension_semantics<parallel>], iteration_bounds = array<i64: 1>, scalar_prefetch = 0 : i64, scratch_operands = 0 : i64, tpu.core_type = #tpu.core_type<tc>, window_params = [{transform_indices = @transform_0, window_bounds = array<i64: 8, 16>}, {pipeline_mode = #tpu.pipeline_mode<synchronous>, transform_indices = @transform_1, window_bounds = array<i64: 16, 128>}, {pipeline_mode = #tpu.pipeline_mode<synchronous>, transform_indices = @transform_2, window_bounds = array<i64: 1, 128>}, {pipeline_mode = #tpu.pipeline_mode<synchronous>, transform_indices = @transform_3, window_bounds = array<i64: 128, 128>}, {pipeline_mode = #tpu.pipeline_mode<synchronous>, transform_indices = @transform_4, window_bounds = array<i64: 1, 128>}, {pipeline_mode = #tpu.pipeline_mode<synchronous>, transform_indices = @transform_5, window_bounds = array<i64: 128, 8>}, {pipeline_mode = #tpu.pipeline_mode<synchronous>, transform_indices = @transform_6, window_bounds = array<i64: 1, 8>}, {transform_indices = @transform_7, window_bounds = array<i64: 8, 8>}]} {
    %c0 = arith.constant 0 : index
    %c0_0 = arith.constant 0 : index
    %0 = vector.load %arg1[%c0, %c0_0] : memref<8x16xf32, #tpu.memory_space<vmem>>, vector<8x16xf32>
    %c0_1 = arith.constant 0 : index
    %c0_2 = arith.constant 0 : index
    %1 = vector.load %arg2[%c0_1, %c0_2] : memref<16x128xf32, #tpu.memory_space<vmem>>, vector<16x128xf32>
    %cst = arith.constant dense<0.000000e+00> : vector<8x128xf32>
    %2 = tpu.matmul %0, %1, %cst {dimension_numbers = #tpu.dot_dimension_numbers<[1], [0], [0], [1], [0, 0, 1, 1], [], []>} : vector<8x16xf32>, vector<16x128xf32>, vector<8x128xf32> -> vector<8x128xf32>
    %c0_3 = arith.constant 0 : index
    %c0_4 = arith.constant 0 : index
    %3 = vector.load %arg3[%c0_3, %c0_4] : memref<1x128xf32, #tpu.memory_space<vmem>>, vector<1x128xf32>
    %4 = vector.broadcast %3 : vector<1x128xf32> to vector<8x128xf32>
    %5 = arith.addf %2, %4 : vector<8x128xf32>
    %cst_5 = arith.constant 0.000000e+00 : f32
    %6 = vector.broadcast %cst_5 : f32 to vector<8x128xf32>
    %7 = arith.maximumf %5, %6 : vector<8x128xf32>
    %c0_6 = arith.constant 0 : index
    %c0_7 = arith.constant 0 : index
    %8 = vector.load %arg4[%c0_6, %c0_7] : memref<128x128xf32, #tpu.memory_space<vmem>>, vector<128x128xf32>
    %cst_8 = arith.constant dense<0.000000e+00> : vector<8x128xf32>
    %9 = tpu.matmul %7, %8, %cst_8 {dimension_numbers = #tpu.dot_dimension_numbers<[1], [0], [0], [1], [0, 0, 1, 1], [], []>} : vector<8x128xf32>, vector<128x128xf32>, vector<8x128xf32> -> vector<8x128xf32>
    %c0_9 = arith.constant 0 : index
    %c0_10 = arith.constant 0 : index
    %10 = vector.load %arg5[%c0_9, %c0_10] : memref<1x128xf32, #tpu.memory_space<vmem>>, vector<1x128xf32>
    %11 = vector.broadcast %10 : vector<1x128xf32> to vector<8x128xf32>
    %12 = arith.addf %9, %11 : vector<8x128xf32>
    %cst_11 = arith.constant 0.000000e+00 : f32
    %13 = vector.broadcast %cst_11 : f32 to vector<8x128xf32>
    %14 = arith.maximumf %12, %13 : vector<8x128xf32>
    %c0_12 = arith.constant 0 : index
    %c0_13 = arith.constant 0 : index
    %15 = vector.load %arg6[%c0_12, %c0_13] : memref<128x8xf32, #tpu.memory_space<vmem>>, vector<128x8xf32>
    %cst_14 = arith.constant dense<0.000000e+00> : vector<8x8xf32>
    %16 = tpu.matmul %14, %15, %cst_14 {dimension_numbers = #tpu.dot_dimension_numbers<[1], [0], [0], [1], [0, 0, 1, 1], [], []>} : vector<8x128xf32>, vector<128x8xf32>, vector<8x8xf32> -> vector<8x8xf32>
    %c0_15 = arith.constant 0 : index
    %c0_16 = arith.constant 0 : index
    %17 = vector.load %arg7[%c0_15, %c0_16] : memref<1x8xf32, #tpu.memory_space<vmem>>, vector<1x8xf32>
    %18 = vector.broadcast %17 : vector<1x8xf32> to vector<8x8xf32>
    %19 = arith.addf %16, %18 : vector<8x8xf32>
    %c0_17 = arith.constant 0 : index
    %c0_18 = arith.constant 0 : index
    %20 = vector.load %arg8[%c0_17, %c0_18] : memref<8x8xf32, #tpu.memory_space<vmem>>, vector<8x8xf32>
    tpu.vector_store %arg8[%c0_17, %c0_18], %19 {strides = array<i32>} : memref<8x8xf32, #tpu.memory_space<vmem>>, vector<8x8xf32>,
    return
  }
  func.func @transform_0(%arg0: i32) -> (i32, i32) {
    %c0_i32 = arith.constant 0 : i32
    %c0_i32_0 = arith.constant 0 : i32
    return %arg0, %c0_i32 : i32, i32
  }
  func.func @transform_1(%arg0: i32) -> (i32, i32) {
    %c0_i32 = arith.constant 0 : i32
    %c0_i32_0 = arith.constant 0 : i32
    %c0_i32_1 = arith.constant 0 : i32
    return %c0_i32, %c0_i32_0 : i32, i32
  }
  func.func @transform_2(%arg0: i32) -> (i32, i32) {
    %c0_i32 = arith.constant 0 : i32
    %c0_i32_0 = arith.constant 0 : i32
    %c0_i32_1 = arith.constant 0 : i32
    return %c0_i32, %c0_i32_0 : i32, i32
  }
  func.func @transform_3(%arg0: i32) -> (i32, i32) {
    %c0_i32 = arith.constant 0 : i32
    %c0_i32_0 = arith.constant 0 : i32
    %c0_i32_1 = arith.constant 0 : i32
    return %c0_i32, %c0_i32_0 : i32, i32
  }
  func.func @transform_4(%arg0: i32) -> (i32, i32) {
    %c0_i32 = arith.constant 0 : i32
    %c0_i32_0 = arith.constant 0 : i32
    %c0_i32_1 = arith.constant 0 : i32
    return %c0_i32, %c0_i32_0 : i32, i32
  }
  func.func @transform_5(%arg0: i32) -> (i32, i32) {
    %c0_i32 = arith.constant 0 : i32
    %c0_i32_0 = arith.constant 0 : i32
    %c0_i32_1 = arith.constant 0 : i32
    return %c0_i32, %c0_i32_0 : i32, i32
  }
  func.func @transform_6(%arg0: i32) -> (i32, i32) {
    %c0_i32 = arith.constant 0 : i32
    %c0_i32_0 = arith.constant 0 : i32
    %c0_i32_1 = arith.constant 0 : i32
    return %c0_i32, %c0_i32_0 : i32, i32
  }
  func.func @transform_7(%arg0: i32) -> (i32, i32) {
    %c0_i32 = arith.constant 0 : i32
    %c0_i32_0 = arith.constant 0 : i32
    return %arg0, %c0_i32 : i32, i32
  }
}

</mosaic_0001>

<bundles_post_ra>
// kernel: tpu_custom_call.1
= control target key start
LH: loop header
LB: loop body
LE: loop exit
PB: predicated region body
PF: predicated region fallthrough
CT: control target
= control target key end

     0   :  { %12 = vsyncpa [#allocation3], 0  ;;  %s735_s0 = inlined_call_operand.vmem [shape: f32[8,16], index: 0, kind: input, shape index: {}]   ;;  %s736_s1 = inlined_call_operand.hbm [shape: f32[16,128], index: 1, kind: input, shape index: {}]   ;;  %s737_s2 = inlined_call_operand.vmem [shape: f32[1,128], index: 2, kind: input, shape index: {}]   ;;  %s738_s3 = inlined_call_operand.vmem [shape: f32[128,128], index: 3, kind: input, shape index: {}]   ;;  %s739_s4 = inlined_call_operand.hbm [shape: f32[1,128], index: 4, kind: input, shape index: {}]   ;;  %s740_s5 = inlined_call_operand.vmem [shape: f32[128,8], index: 5, kind: input, shape index: {}]   ;;  %s741_s6 = inlined_call_operand.vmem [shape: f32[1,8], index: 6, kind: input, shape index: {}]   ;;  %s742_s7 = inlined_call_operand.hbm [shape: f32[8,8], index: 7, kind: output, shape index: {}]  }
   0x1   :  { %13 = vsyncpa [#allocation6], 0 }
   0x2   :  { %14 = vsyncpa [#allocation4], 0  ;;  %s534_s24 = smov [#allocation2]  }
   0x3   :  { %s22_s25 = sshll.u32 %s534_s24, 4  ;;  %s23_s25 = int_to_ptr.vmem [resolvable:$true] %s22_s25 }
   0x4   :  { %s476_s26 = scalar_lea.vmem %s23_s25, 256  ;;  %p481_p1 = scmp.lt.s32.totalorder %s23_s25, %s23_s25 }
   0x5   :  { %p477_p0 = scmp.ne.s32.totalorder %s23_s25, %s476_s26  ;;  %p482_p2 = scmp.lt.s32.totalorder %s476_s26, %s476_s26 }
   0x7   :  { %p483_p3 = por %p482_p2, %p481_p1 }
   0x9   :  { %p484_p4 = pnand %p483_p3, %p477_p0 }
   0xb   :  { %487 = shalt.err (!%p484_p4)
}
   0xc   :  { %s535_s27 = smov 128   ;;  %s536_s28 = smov 8  }
   0xd   :  { %28 = dma.hbm_to_vmem [thread:$0]  %s736_s1, 256, %s23_s25, [#allocation3], %s535_s27, %s535_s27, %s536_s28  }
   0xe   :  { %s537_s8 = smov [#allocation5]  }
   0xf   :  { %s39_s9 = sshll.u32 %s537_s8, 4  ;;  %s40_s9 = int_to_ptr.vmem [resolvable:$true] %s39_s9 }
  0x10   :  { %s496_s10 = scalar_lea.vmem %s40_s9, 16  ;;  %s500_s11 = scalar_lea.vmem %s40_s9, 32 }
  0x11   :  { %p497_p5 = scmp.ne.s32.totalorder %s40_s9, %s496_s10  ;;  %p501_p6 = scmp.lt.s32.totalorder %s40_s9, %s40_s9 }
  0x12   :  { %p502_p7 = scmp.lt.s32.totalorder %s500_s11, %s496_s10 }
  0x14   :  { %p503_p8 = por %p502_p7, %p501_p6 }
  0x16   :  { %p504_p9 = pnand %p503_p8, %p497_p5 }
  0x18   :  { %507 = shalt.err (!%p504_p9)
}
  0x19   :  { %42 = dma.hbm_to_vmem [thread:$0]  %s739_s4, 16, %s40_s9, [#allocation6]  }
  0x1a   :  { %528 = dma.done.wait [#allocation3], 256  }
  0x1b   :  { %529 = vsyncadd [#allocation3], 4294967040 }
  0x1c   :  { %530 = dma.done.wait [#allocation6], 16  }
  0x1d   :  { %531 = vsyncadd [#allocation6], 4294967280  ;;  %v538_v0 = vmov 0.0   ;;  %vm539_vm0 = vmmov 0   ;;  %v55_v1 = vld [vmem:[#allocation2 + $0x8] sm:$0xff]  ;;  %v54_v2 = vld [vmem:[#allocation2] sm:$0xff] }
  0x1e   :  { %384 = vmatprep.subr.mxu0 %v538_v0  ;;  %388 = vmatprep.mubr.msk.f32.mxu0 %vm539_vm0, %v538_v0  ;;  %v53_v3 = vld [vmem:[%s735_s0] sm:$0xff]  ;;  %vm63_vm1 = vcmask 130048   ;;  %v153_v4 = vld [vmem:[%s738_s3 + $0x78] sm:$0xff]  ;;  %v152_v5 = vld [vmem:[%s738_s3 + $0x70] sm:$0xff]  ;;  %s540_s26 = smov [#allocation7]   ;;  %vm325_vm2 = vcmask 64512  }
  0x1f   :  { %391 = vmatprep.subr.mxu1 %v538_v0  ;;  %423 = vmatprep.mubr.msk.f32.mxu1 %vm539_vm0, %v538_v0  ;;  %v151_v6 = vld [vmem:[%s738_s3 + $0x68] sm:$0xff]  ;;  %v150_v7 = vld [vmem:[%s738_s3 + $0x60] sm:$0xff]  ;;  %v149_v8 = vld [vmem:[%s738_s3 + $0x58] sm:$0xff]  ;;  %s333_s27 = sshll.u32 %s540_s26, 4  ;;  %s334_s27 = int_to_ptr.vmem [resolvable:$true] %s333_s27 }
  0x20   :  { %385 = vmatpush3.msra.mxu0 %v55_v1  ;;  %392 = vmatpush3.msra.mxu1 %v153_v4  ;;  %v148_v9 = vld [vmem:[%s738_s3 + $0x50] sm:$0xff]  ;;  %v147_v10 = vld [vmem:[%s738_s3 + $0x48] sm:$0xff]  ;;  %v146_v11 = vld [vmem:[%s738_s3 + $0x40] sm:$0xff]  ;;  %p513_p11 = scmp.lt.s32.totalorder %s334_s27, %s334_s27 }
  0x21   :  { %386 = vmatprep.subr.mxu0 %v538_v0  ;;  %393 = vmatprep.subr.mxu1 %v538_v0  ;;  %v145_v12 = vld [vmem:[%s738_s3 + $0x38] sm:$0xff]  ;;  %v144_v13 = vld [vmem:[%s738_s3 + $0x30] sm:$0xff]  ;;  %v143_v14 = vld [vmem:[%s738_s3 + $0x28] sm:$0xff] }
  0x22   :  { %387 = vmatpush3.msra.mxu0 %v54_v2  ;;  %394 = vmatpush3.msra.mxu1 %v152_v5  ;;  %v142_v15 = vld [vmem:[%s738_s3 + $0x20] sm:$0xff]  ;;  %v141_v16 = vld [vmem:[%s738_s3 + $0x18] sm:$0xff]  ;;  %v140_v17 = vld [vmem:[%s738_s3 + $0x10] sm:$0xff] }
  0x23   :  { %389 = vmatmul.mubr.msk.f32.vlgmr.msra.gmra.mxu0 %vm63_vm1, %v53_v3  ;;  %395 = vmatprep.subr.mxu1 %v538_v0  ;;  %v139_v18 = vld [vmem:[%s738_s3 + $0x8] sm:$0xff]  ;;  %v138_v19 = vld [vmem:[%s738_s3] sm:$0xff]  ;;  %v247_v20 = vld [vmem:[%s740_s5 + $0x78] sm:$0xff] }
  0x24   :  { %426 = vmatprep.subr.mxu0 %v538_v0  ;;  %396 = vmatpush3.msra.mxu1 %v151_v6  ;;  %v246_v21 = vld [vmem:[%s740_s5 + $0x70] sm:$0xff]  ;;  %v245_v22 = vld [vmem:[%s740_s5 + $0x68] sm:$0xff]  ;;  %v244_v23 = vld [vmem:[%s740_s5 + $0x60] sm:$0xff] }
  0x25   :  { %458 = vmatprep.mubr.msk.f32.mxu0 %vm539_vm0, %v538_v0  ;;  %397 = vmatprep.subr.mxu1 %v538_v0  ;;  %v243_v24 = vld [vmem:[%s740_s5 + $0x58] sm:$0xff]  ;;  %v242_v25 = vld [vmem:[%s740_s5 + $0x50] sm:$0xff]  ;;  %v241_v26 = vld [vmem:[%s740_s5 + $0x48] sm:$0xff] }
  0x26   :  { %398 = vmatpush3.msra.mxu1 %v150_v7  ;;  %427 = vmatpush3.msra.mxu0 %v247_v20  ;;  %v240_v27 = vld [vmem:[%s740_s5 + $0x40] sm:$0xff]  ;;  %v239_v28 = vld [vmem:[%s740_s5 + $0x38] sm:$0xff]  ;;  %v238_v29 = vld [vmem:[%s740_s5 + $0x30] sm:$0xff] }
  0x27   :  { %399 = vmatprep.subr.mxu1 %v538_v0  ;;  %428 = vmatprep.subr.mxu0 %v538_v0  ;;  %v237_v30 = vld [vmem:[%s740_s5 + $0x28] sm:$0xff]  ;;  %v236_v31 = vld [vmem:[%s740_s5 + $0x20] sm:$0xff]  ;;  %v235_v32 = vld [vmem:[%s740_s5 + $0x18] sm:$0xff] }
  0x28   :  { %400 = vmatpush3.msra.mxu1 %v149_v8  ;;  %429 = vmatpush3.msra.mxu0 %v246_v21  ;;  %v343_v33 = vld [vmem:[%s737_s2] ss:$0 sm:$0xff]  ;;  %v234_v38 = vld [vmem:[%s740_s5 + $0x10] sm:$0xff]  ;;  %v233_v39 = vld [vmem:[%s740_s5 + $0x8] sm:$0xff] }
  0x29   :  { %401 = vmatprep.subr.mxu1 %v538_v0  ;;  %430 = vmatprep.subr.mxu0 %v538_v0  ;;  %v232_v40 = vld [vmem:[%s740_s5] sm:$0xff]  ;;  %v345_v41 = vld [vmem:[#allocation5] ss:$0 sm:$0xff]  ;;  %s508_s5 = scalar_lea.vmem %s334_s27, 128 }
  0x2a   :  { %402 = vmatpush3.msra.mxu1 %v148_v9  ;;  %431 = vmatpush3.msra.mxu0 %v245_v22  ;;  %v346_v46 = vld [vmem:[%s741_s6] ss:$0 sm:$0xff]  ;;  %p509_p10 = scmp.ne.s32.totalorder %s334_s27, %s508_s5  ;;  %p514_p12 = scmp.lt.s32.totalorder %s508_s5, %s508_s5 }
  0x2b   :  { %403 = vmatprep.subr.mxu1 %v538_v0  ;;  %432 = vmatprep.subr.mxu0 %v538_v0 }
  0x2c   :  { %404 = vmatpush3.msra.mxu1 %v147_v10  ;;  %433 = vmatpush3.msra.mxu0 %v244_v23  ;;  %p515_p13 = por %p514_p12, %p513_p11 }
  0x2d   :  { %405 = vmatprep.subr.mxu1 %v538_v0  ;;  %434 = vmatprep.subr.mxu0 %v538_v0 }
  0x2e   :  { %406 = vmatpush3.msra.mxu1 %v146_v11  ;;  %435 = vmatpush3.msra.mxu0 %v243_v24  ;;  %p516_p0 = pnand %p515_p13, %p509_p10 }
  0x2f   :  { %407 = vmatprep.subr.mxu1 %v538_v0  ;;  %436 = vmatprep.subr.mxu0 %v538_v0 }
  0x30   :  { %408 = vmatpush3.msra.mxu1 %v145_v12  ;;  %437 = vmatpush3.msra.mxu0 %v242_v25 }
  0x31   :  { %409 = vmatprep.subr.mxu1 %v538_v0  ;;  %438 = vmatprep.subr.mxu0 %v538_v0 }
  0x32   :  { %410 = vmatpush3.msra.mxu1 %v144_v13  ;;  %439 = vmatpush3.msra.mxu0 %v241_v26 }
  0x33   :  { %411 = vmatprep.subr.mxu1 %v538_v0  ;;  %440 = vmatprep.subr.mxu0 %v538_v0 }
  0x34   :  { %412 = vmatpush3.msra.mxu1 %v143_v14  ;;  %441 = vmatpush3.msra.mxu0 %v240_v27 }
  0x35   :  { %413 = vmatprep.subr.mxu1 %v538_v0  ;;  %442 = vmatprep.subr.mxu0 %v538_v0 }
  0x36   :  { %414 = vmatpush3.msra.mxu1 %v142_v15  ;;  %443 = vmatpush3.msra.mxu0 %v239_v28 }
  0x37   :  { %415 = vmatprep.subr.mxu1 %v538_v0  ;;  %444 = vmatprep.subr.mxu0 %v538_v0 }
  0x38   :  { %416 = vmatpush3.msra.mxu1 %v141_v16  ;;  %445 = vmatpush3.msra.mxu0 %v238_v29 }
  0x39   :  { %417 = vmatprep.subr.mxu1 %v538_v0  ;;  %446 = vmatprep.subr.mxu0 %v538_v0 }
  0x3a   :  { %418 = vmatpush3.msra.mxu1 %v140_v17  ;;  %447 = vmatpush3.msra.mxu0 %v237_v30 }
  0x3b   :  { %419 = vmatprep.subr.mxu1 %v538_v0  ;;  %448 = vmatprep.subr.mxu0 %v538_v0 }
  0x3c   :  { %420 = vmatpush3.msra.mxu1 %v139_v18  ;;  %449 = vmatpush3.msra.mxu0 %v236_v31 }
  0x3d   :  { %421 = vmatprep.subr.mxu1 %v538_v0  ;;  %450 = vmatprep.subr.mxu0 %v538_v0 }
  0x3e   :  { %422 = vmatpush3.msra.mxu1 %v138_v19  ;;  %451 = vmatpush3.msra.mxu0 %v235_v32 }
  0x3f   :  { %452 = vmatprep.subr.mxu0 %v538_v0 }
  0x40   :  { %453 = vmatpush3.msra.mxu0 %v234_v38 }
  0x41   :  { %454 = vmatprep.subr.mxu0 %v538_v0 }
  0x42   :  { %455 = vmatpush3.msra.mxu0 %v233_v39 }
  0x43   :  { %456 = vmatprep.subr.mxu0 %v538_v0 }
  0x44   :  { %457 = vmatpush3.msra.mxu0 %v232_v40 }
  0xe3   :  { %v133_v34 = vpop.f32.mrf.mxu0 }
  0xe4   :  { %v134_v35 = vadd.f32 %v343_v33, %v133_v34 }
  0xe5   :  { %v390_v36 = vpop.f32.mrf.mxu0 }
  0xe6   :  { %v137_v37 = vmax.f32 %v134_v35, 0.0 }
  0xe8   :  { %424 = vmatmul.mubr.f32.vlgmr.msra.gmra.mxu1 %v137_v37 }
 0x1a8   :  { %v227_v42 = vpop.f32.mrf.mxu1 }
 0x1a9   :  { %v228_v43 = vadd.f32 %v345_v41, %v227_v42 }
 0x1aa   :  { %v425_v44 = vpop.f32.mrf.mxu1 }
 0x1ab   :  { %v231_v45 = vmax.f32 %v228_v43, 0.0 }
 0x1ad   :  { %459 = vmatmul.mubr.f32.vlgmr.msra.gmra.mxu0 %v231_v45 }
 0x26d   :  { %v321_v47 = vpop.f32.mrf.mxu0 }
 0x26e   :  { %v322_v48 = vadd.f32 %v346_v46, %v321_v47 }
 0x26f   :  { %v460_v49 = vpop.f32.mrf.mxu0 }
 0x270   :  { %326 = vst.msk [vmem:[#allocation7] sm:$0xff] %vm325_vm2, %v322_v48 }
 0x271   :  { %519 = shalt.err (!%p516_p0)
}
 0x272   :  { %336 = dma.vmem_to_hbm [thread:$0]  %s334_s27, 128, %s742_s7, [#allocation4]  }
 0x273   :  { %532 = dma.done.wait [#allocation4], 128  }
 0x274   :  { %533 = vsyncadd [#allocation4], 4294967168 }
 0x275   :  { %340 = vsyncpa [#allocation3], 1 }
 0x276   :  { %341 = vsyncpa [#allocation6], 1 }
 0x277   :  { %342 = vsyncpa [#allocation4], 1 }

</bundles_post_ra>
